<compile_context>
chip_gen: v6e
topology: v6e:2x2x1
jax: 0.10.0
libtpu: 0.0.40
codegen_flags: <defaults>
</compile_context>

<pallas_src>
import functools

import jax
import jax.numpy as jnp
from jax.experimental import pallas as pl
from jax.experimental.pallas import tpu as pltpu

HIDDEN = 256
LANE = 128
TB_MAX = 4096       # cap on batch rows per grid step (bf16, lane-dense => tiny VMEM)
MIN_SPLIT = 512     # batches >= this get >=2 grid steps (v7x has 2 TensorCores)
LOG_STD_MIN = -20.0
LOG_STD_MAX = 2.0


def _round_up(x, m):
    return (x + m - 1) // m * m


def _choose_tb(batch):
    """Pick the batch tile: minimize dead padded rows, round to 16 rows, cap at
    TB_MAX, and use at least 2 grid steps for large batches (megacore)."""
    n_steps = pl.cdiv(batch, TB_MAX)
    if n_steps < 2 and batch >= MIN_SPLIT:
        n_steps = 2
    return _round_up(pl.cdiv(batch, n_steps), 16)


def actor_fused_kernel(a_dim, s_ref, w1_ref, b1_ref, w2_ref, b2_ref,
                       wh_ref, bh_ref, out_ref):
    """One batch tile: fc1+relu, fc2+relu, fused (mean|log_std) head.

    s_ref:  [TB, S]          f32  (cast to bf16 in-kernel for the MXU)
    w1_ref: [S, 256]         bf16     b1_ref: [1, 256]      f32
    w2_ref: [256, 256]       bf16     b2_ref: [1, 256]      f32
    wh_ref: [256, HEAD_PAD]  bf16     bh_ref: [1, HEAD_PAD] f32
    out_ref:[TB, HEAD_PAD]   bf16  (cols [0,A) = mean, [A,2A) = std)
    """
    # fc1 + ReLU (bf16 MXU operands, f32 accumulate; elementwise kept in f32)
    x = jnp.dot(s_ref[...].astype(jnp.bfloat16), w1_ref[...],
                preferred_element_type=jnp.float32)
    x = jnp.maximum(x + b1_ref[...], 0.0)

    # fc2 + ReLU
    x = jnp.dot(x.astype(jnp.bfloat16), w2_ref[...],
                preferred_element_type=jnp.float32)
    x = jnp.maximum(x + b2_ref[...], 0.0)

    # fused mean|log_std head -> one lane-dense 128-wide output slab
    h = jnp.dot(x.astype(jnp.bfloat16), wh_ref[...],
                preferred_element_type=jnp.float32)
    h = h + bh_ref[...]

    col = jax.lax.broadcasted_iota(jnp.int32, h.shape, dimension=1)
    std = jnp.exp(jnp.clip(h, LOG_STD_MIN, LOG_STD_MAX))
    # columns < A are the mean head (raw); columns >= A get clamp+exp (std head;
    # padded columns beyond 2A are exp'd too but discarded by the wrapper slice).
    out_ref[...] = jnp.where(col >= a_dim, std, h).astype(out_ref.dtype)


def init_actor_params(key, state_dim, action_dim):
    """Deterministic init mirroring nn.Linear default (uniform +/- 1/sqrt(fan_in))."""
    def linear(key, fan_in, fan_out):
        kw, kb = jax.random.split(key)
        bound = 1.0 / jnp.sqrt(fan_in)
        w = jax.random.uniform(kw, (fan_in, fan_out), jnp.float32, -bound, bound)
        b = jax.random.uniform(kb, (1, fan_out), jnp.float32, -bound, bound)
        return w, b

    k1, k2, k3, k4 = jax.random.split(key, 4)
    w1, b1 = linear(k1, state_dim, HIDDEN)
    w2, b2 = linear(k2, HIDDEN, HIDDEN)
    wm, bm = linear(k3, HIDDEN, action_dim)
    ws, bs = linear(k4, HIDDEN, action_dim)
    return {"w1": w1, "b1": b1, "w2": w2, "b2": b2,
            "wm": wm, "bm": bm, "ws": ws, "bs": bs}


def prepare_actor_params(params):
    """Fuse heads / cast weights once, outside the kernel. No contraction padding."""
    w1, b1 = params["w1"], params["b1"]
    w2, b2 = params["w2"], params["b2"]
    wm, bm = params["wm"], params["bm"]
    ws, bs = params["ws"], params["bs"]

    S = w1.shape[0]
    A = wm.shape[1]
    head_pad = _round_up(max(2 * A, LANE), LANE)

    wh = jnp.zeros((HIDDEN, head_pad), jnp.bfloat16)
    wh = wh.at[:, :A].set(wm.astype(jnp.bfloat16))
    wh = wh.at[:, A:2 * A].set(ws.astype(jnp.bfloat16))

    bh = jnp.zeros((1, head_pad), jnp.float32)
    bh = bh.at[:, :A].set(bm)
    bh = bh.at[:, A:2 * A].set(bs)

    return {
        "w1": w1.astype(jnp.bfloat16), "b1": b1.astype(jnp.float32),
        "w2": w2.astype(jnp.bfloat16), "b2": b2.astype(jnp.float32),
        "wh": wh, "bh": bh,
        "state_dim": int(S), "action_dim": int(A), "head_pad": int(head_pad),
    }


def actor_forward(state, prep):
    """state: [B, state_dim] f32. prep: output of prepare_actor_params. Returns (mean, std)."""
    B = state.shape[0]
    S = prep["state_dim"]
    A = prep["action_dim"]
    head_pad = prep["head_pad"]

    tb = _choose_tb(B)
    grid = (pl.cdiv(B, tb),)

    flops = 2 * B * (S * HIDDEN + HIDDEN * HIDDEN + HIDDEN * head_pad)
    bytes_accessed = (
        B * S * 4                                                       # state (f32, unpadded)
        + (S * HIDDEN + HIDDEN * HIDDEN + HIDDEN * head_pad) * 2        # weights (bf16)
        + (HIDDEN + HIDDEN + head_pad) * 4                              # biases (f32)
        + B * head_pad * 2                                              # output slab (bf16)
    )

    out = pl.pallas_call(
        functools.partial(actor_fused_kernel, A),
        out_shape=jax.ShapeDtypeStruct((B, head_pad), jnp.bfloat16),
        grid=grid,
        in_specs=[
            pl.BlockSpec((tb, S), lambda i: (i, 0)),            # state tile (streamed, unpadded)
            pl.BlockSpec((S, HIDDEN), lambda i: (0, 0)),        # w1 (resident)
            pl.BlockSpec((1, HIDDEN), lambda i: (0, 0)),        # b1
            pl.BlockSpec((HIDDEN, HIDDEN), lambda i: (0, 0)),   # w2
            pl.BlockSpec((1, HIDDEN), lambda i: (0, 0)),        # b2
            pl.BlockSpec((HIDDEN, head_pad), lambda i: (0, 0)), # fused head weights
            pl.BlockSpec((1, head_pad), lambda i: (0, 0)),      # fused head bias
        ],
        out_specs=pl.BlockSpec((tb, head_pad), lambda i: (i, 0)),
        compiler_params=pltpu.CompilerParams(
            dimension_semantics=("parallel",)),
        cost_estimate=pl.CostEstimate(
            flops=flops,
            transcendentals=B * head_pad,
            bytes_accessed=bytes_accessed),
    )(state, prep["w1"], prep["b1"], prep["w2"], prep["b2"],
      prep["wh"], prep["bh"])

    mean = out[:, :A].astype(jnp.float32)
    std = out[:, A:2 * A].astype(jnp.float32)
    return mean, std


def actor_forward_ref(state, p):
    x = jnp.maximum(state @ p["w1"] + p["b1"], 0.0)
    x = jnp.maximum(x @ p["w2"] + p["b2"], 0.0)
    mean = x @ p["wm"] + p["bm"]
    log_std = jnp.clip(x @ p["ws"] + p["bs"], LOG_STD_MIN, LOG_STD_MAX)
    return mean, jnp.exp(log_std)


if __name__ == "__main__":
    key = jax.random.PRNGKey(0)
    k_params, k_state1, k_state2 = jax.random.split(key, 3)

    state_dim = 16
    action_dim = 4
    max_action = 1.0  # unused in forward()

    params = init_actor_params(k_params, state_dim, action_dim)
    prep = prepare_actor_params(params)

    # small test (single grid step, partial block)
    state = jax.random.normal(k_state1, (2, state_dim), jnp.float32)
    mean, std = actor_forward(state, prep)
    jax.block_until_ready((mean, std))

    mean_ref, std_ref = actor_forward_ref(state, params)
    # tolerance loosened for bf16 MXU operands / bf16 output slab
    assert mean.shape == (2, action_dim) and std.shape == (2, action_dim)
    assert jnp.allclose(mean, mean_ref, atol=2e-2, rtol=2e-2)
    assert jnp.allclose(std, std_ref, atol=2e-2, rtol=2e-2)

    # larger batch exercising the 2-step batch grid + partial last block
    state2 = jax.random.normal(k_state2, (600, state_dim), jnp.float32)
    mean2, std2 = actor_forward(state2, prep)
    jax.block_until_ready((mean2, std2))

    mean2_ref, std2_ref = actor_forward_ref(state2, params)
    assert mean2.shape == (600, action_dim) and std2.shape == (600, action_dim)
    assert jnp.allclose(mean2, mean2_ref, atol=2e-2, rtol=2e-2)
    assert jnp.allclose(std2, std2_ref, atol=2e-2, rtol=2e-2)

    print("KERNEL_OK")
</pallas_src>

<mosaic_0001>
module attributes {stable_mosaic.version = 11 : i64} {
  func.func @actor_fused_kernel(%arg0: i32, %arg1: memref<16x16xf32, #tpu.memory_space<vmem>>, %arg2: memref<16x256xbf16, #tpu.memory_space<vmem>>, %arg3: memref<1x256xf32, #tpu.memory_space<vmem>>, %arg4: memref<256x256xbf16, #tpu.memory_space<vmem>>, %arg5: memref<1x256xf32, #tpu.memory_space<vmem>>, %arg6: memref<256x128xbf16, #tpu.memory_space<vmem>>, %arg7: memref<1x128xf32, #tpu.memory_space<vmem>>, %arg8: memref<16x128xbf16, #tpu.memory_space<vmem>>) attributes {dimension_semantics = [#tpu.dimension_semantics<parallel>], iteration_bounds = array<i64: 1>, scalar_prefetch = 0 : i64, scratch_operands = 0 : i64, tpu.core_type = #tpu.core_type<tc>, window_params = [{transform_indices = @transform_0, window_bounds = array<i64: 16, 16>}, {pipeline_mode = #tpu.pipeline_mode<synchronous>, transform_indices = @transform_1, window_bounds = array<i64: 16, 256>}, {pipeline_mode = #tpu.pipeline_mode<synchronous>, transform_indices = @transform_2, window_bounds = array<i64: 1, 256>}, {pipeline_mode = #tpu.pipeline_mode<synchronous>, transform_indices = @transform_3, window_bounds = array<i64: 256, 256>}, {pipeline_mode = #tpu.pipeline_mode<synchronous>, transform_indices = @transform_4, window_bounds = array<i64: 1, 256>}, {pipeline_mode = #tpu.pipeline_mode<synchronous>, transform_indices = @transform_5, window_bounds = array<i64: 256, 128>}, {pipeline_mode = #tpu.pipeline_mode<synchronous>, transform_indices = @transform_6, window_bounds = array<i64: 1, 128>}, {transform_indices = @transform_7, window_bounds = array<i64: 16, 128>}]} {
    %c0 = arith.constant 0 : index
    %c0_0 = arith.constant 0 : index
    %0 = vector.load %arg1[%c0, %c0_0] : memref<16x16xf32, #tpu.memory_space<vmem>>, vector<16x16xf32>
    %1 = arith.truncf %0 : vector<16x16xf32> to vector<16x16xbf16>
    %c0_1 = arith.constant 0 : index
    %c0_2 = arith.constant 0 : index
    %2 = vector.load %arg2[%c0_1, %c0_2] : memref<16x256xbf16, #tpu.memory_space<vmem>>, vector<16x256xbf16>
    %cst = arith.constant dense<0.000000e+00> : vector<16x256xf32>
    %3 = tpu.matmul %1, %2, %cst {dimension_numbers = #tpu.dot_dimension_numbers<[1], [0], [0], [1], [0, 0, 1, 1], [], []>} : vector<16x16xbf16>, vector<16x256xbf16>, vector<16x256xf32> -> vector<16x256xf32>
    %c0_3 = arith.constant 0 : index
    %c0_4 = arith.constant 0 : index
    %4 = vector.load %arg3[%c0_3, %c0_4] : memref<1x256xf32, #tpu.memory_space<vmem>>, vector<1x256xf32>
    %5 = vector.broadcast %4 : vector<1x256xf32> to vector<16x256xf32>
    %6 = arith.addf %3, %5 : vector<16x256xf32>
    %cst_5 = arith.constant 0.000000e+00 : f32
    %7 = vector.broadcast %cst_5 : f32 to vector<16x256xf32>
    %8 = arith.maximumf %6, %7 : vector<16x256xf32>
    %9 = arith.truncf %8 : vector<16x256xf32> to vector<16x256xbf16>
    %c0_6 = arith.constant 0 : index
    %c0_7 = arith.constant 0 : index
    %10 = vector.load %arg4[%c0_6, %c0_7] : memref<256x256xbf16, #tpu.memory_space<vmem>>, vector<256x256xbf16>
    %cst_8 = arith.constant dense<0.000000e+00> : vector<16x256xf32>
    %11 = tpu.matmul %9, %10, %cst_8 {dimension_numbers = #tpu.dot_dimension_numbers<[1], [0], [0], [1], [0, 0, 1, 1], [], []>} : vector<16x256xbf16>, vector<256x256xbf16>, vector<16x256xf32> -> vector<16x256xf32>
    %c0_9 = arith.constant 0 : index
    %c0_10 = arith.constant 0 : index
    %12 = vector.load %arg5[%c0_9, %c0_10] : memref<1x256xf32, #tpu.memory_space<vmem>>, vector<1x256xf32>
    %13 = vector.broadcast %12 : vector<1x256xf32> to vector<16x256xf32>
    %14 = arith.addf %11, %13 : vector<16x256xf32>
    %cst_11 = arith.constant 0.000000e+00 : f32
    %15 = vector.broadcast %cst_11 : f32 to vector<16x256xf32>
    %16 = arith.maximumf %14, %15 : vector<16x256xf32>
    %17 = arith.truncf %16 : vector<16x256xf32> to vector<16x256xbf16>
    %c0_12 = arith.constant 0 : index
    %c0_13 = arith.constant 0 : index
    %18 = vector.load %arg6[%c0_12, %c0_13] : memref<256x128xbf16, #tpu.memory_space<vmem>>, vector<256x128xbf16>
    %cst_14 = arith.constant dense<0.000000e+00> : vector<16x128xf32>
    %19 = tpu.matmul %17, %18, %cst_14 {dimension_numbers = #tpu.dot_dimension_numbers<[1], [0], [0], [1], [0, 0, 1, 1], [], []>} : vector<16x256xbf16>, vector<256x128xbf16>, vector<16x128xf32> -> vector<16x128xf32>
    %c0_15 = arith.constant 0 : index
    %c0_16 = arith.constant 0 : index
    %20 = vector.load %arg7[%c0_15, %c0_16] : memref<1x128xf32, #tpu.memory_space<vmem>>, vector<1x128xf32>
    %21 = vector.broadcast %20 : vector<1x128xf32> to vector<16x128xf32>
    %22 = arith.addf %19, %21 : vector<16x128xf32>
    %23 = tpu.iota {dimensions = array<i32: 1>} : vector<16x128xi32>
    %cst_17 = arith.constant -2.000000e+01 : f32
    %cst_18 = arith.constant 2.000000e+00 : f32
    %24 = vector.broadcast %cst_17 : f32 to vector<16x128xf32>
    %25 = arith.maximumf %24, %22 : vector<16x128xf32>
    %26 = vector.broadcast %cst_18 : f32 to vector<16x128xf32>
    %27 = arith.minimumf %26, %25 : vector<16x128xf32>
    %28 = math.exp %27 : vector<16x128xf32>
    %c4_i32 = arith.constant 4 : i32
    %29 = vector.broadcast %c4_i32 : i32 to vector<16x128xi32>
    %30 = arith.cmpi sge, %23, %29 : vector<16x128xi32>
    %31 = arith.select %30, %28, %22 : vector<16x128xi1>, vector<16x128xf32>
    %32 = arith.truncf %31 : vector<16x128xf32> to vector<16x128xbf16>
    %c0_19 = arith.constant 0 : index
    %c0_20 = arith.constant 0 : index
    %33 = vector.load %arg8[%c0_19, %c0_20] : memref<16x128xbf16, #tpu.memory_space<vmem>>, vector<16x128xbf16>
    tpu.vector_store %arg8[%c0_19, %c0_20], %32 {strides = array<i32>} : memref<16x128xbf16, #tpu.memory_space<vmem>>, vector<16x128xbf16>,
    return
  }
  func.func @transform_0(%arg0: i32) -> (i32, i32) {
    %c0_i32 = arith.constant 0 : i32
    %c0_i32_0 = arith.constant 0 : i32
    return %arg0, %c0_i32 : i32, i32
  }
  func.func @transform_1(%arg0: i32) -> (i32, i32) {
    %c0_i32 = arith.constant 0 : i32
    %c0_i32_0 = arith.constant 0 : i32
    %c0_i32_1 = arith.constant 0 : i32
    return %c0_i32, %c0_i32_0 : i32, i32
  }
  func.func @transform_2(%arg0: i32) -> (i32, i32) {
    %c0_i32 = arith.constant 0 : i32
    %c0_i32_0 = arith.constant 0 : i32
    %c0_i32_1 = arith.constant 0 : i32
    return %c0_i32, %c0_i32_0 : i32, i32
  }
  func.func @transform_3(%arg0: i32) -> (i32, i32) {
    %c0_i32 = arith.constant 0 : i32
    %c0_i32_0 = arith.constant 0 : i32
    %c0_i32_1 = arith.constant 0 : i32
    return %c0_i32, %c0_i32_0 : i32, i32
  }
  func.func @transform_4(%arg0: i32) -> (i32, i32) {
    %c0_i32 = arith.constant 0 : i32
    %c0_i32_0 = arith.constant 0 : i32
    %c0_i32_1 = arith.constant 0 : i32
    return %c0_i32, %c0_i32_0 : i32, i32
  }
  func.func @transform_5(%arg0: i32) -> (i32, i32) {
    %c0_i32 = arith.constant 0 : i32
    %c0_i32_0 = arith.constant 0 : i32
    %c0_i32_1 = arith.constant 0 : i32
    return %c0_i32, %c0_i32_0 : i32, i32
  }
  func.func @transform_6(%arg0: i32) -> (i32, i32) {
    %c0_i32 = arith.constant 0 : i32
    %c0_i32_0 = arith.constant 0 : i32
    %c0_i32_1 = arith.constant 0 : i32
    return %c0_i32, %c0_i32_0 : i32, i32
  }
  func.func @transform_7(%arg0: i32) -> (i32, i32) {
    %c0_i32 = arith.constant 0 : i32
    %c0_i32_0 = arith.constant 0 : i32
    return %arg0, %c0_i32 : i32, i32
  }
}

</mosaic_0001>

<bundles_post_ra>
// kernel: tpu_custom_call.1
= control target key start
LH: loop header
LB: loop body
LE: loop exit
PB: predicated region body
PF: predicated region fallthrough
CT: control target
= control target key end

     0   :  { %12 = vsyncpa [#allocation3], 0  ;;  %s1056_s0 = inlined_call_operand.hbm [shape: f32[2,16], index: 0, kind: input, shape index: {}]   ;;  %s1057_s1 = inlined_call_operand.hbm [shape: bf16[16,256], index: 1, kind: input, shape index: {}]   ;;  %s1058_s2 = inlined_call_operand.vmem [shape: f32[1,256], index: 2, kind: input, shape index: {}]   ;;  %s1059_s3 = inlined_call_operand.hbm [shape: bf16[256,256], index: 3, kind: input, shape index: {}]   ;;  %s1060_s4 = inlined_call_operand.vmem [shape: f32[1,256], index: 4, kind: input, shape index: {}]   ;;  %s1061_s5 = inlined_call_operand.hbm [shape: bf16[256,128], index: 5, kind: input, shape index: {}]   ;;  %s1062_s6 = inlined_call_operand.vmem [shape: f32[1,128], index: 6, kind: input, shape index: {}]   ;;  %s1063_s7 = inlined_call_operand.hbm [shape: bf16[2,128], index: 7, kind: output, shape index: {}]  }
   0x1   :  { %13 = vsyncpa [#allocation6], 0 }
   0x2   :  { %14 = vsyncpa [#allocation9], 0 }
   0x3   :  { %15 = vsyncpa [#allocation4], 0 }
   0x4   :  { %20 = vsyncadd [#allocation3], 224  ;;  %s964_s24 = smov [#allocation5]  }
   0x5   :  { %s33_s25 = sshll.u32 %s964_s24, 4  ;;  %s34_s25 = int_to_ptr.vmem [resolvable:$true] %s33_s25 }
   0x6   :  { %s864_s26 = scalar_lea.vmem %s34_s25, 256  ;;  %p869_p1 = scmp.lt.s32.totalorder %s34_s25, %s34_s25 }
   0x7   :  { %p865_p0 = scmp.ne.s32.totalorder %s34_s25, %s864_s26  ;;  %p870_p2 = scmp.lt.s32.totalorder %s864_s26, %s864_s26 }
   0x9   :  { %p871_p3 = por %p870_p2, %p869_p1 }
   0xb   :  { %p872_p4 = pnand %p871_p3, %p865_p0 }
   0xd   :  { %875 = shalt.err (!%p872_p4)
}
   0xe   :  { %s965_s27 = smov 128   ;;  %s966_s28 = smov 8  }
   0xf   :  { %39 = dma.hbm_to_vmem [thread:$0]  %s1057_s1, 256, %s34_s25, [#allocation6], %s965_s27, %s965_s27, %s966_s28  }
  0x10   :  { %s967_s8 = smov [#allocation2]  }
  0x11   :  { %s21_s9 = sshll.u32 %s967_s8, 4  ;;  %s22_s9 = int_to_ptr.vmem [resolvable:$true] %s21_s9 }
  0x12   :  { %s884_s10 = scalar_lea.vmem %s22_s9, 32  ;;  %s888_s11 = scalar_lea.vmem %s22_s9, 256 }
  0x13   :  { %p885_p5 = scmp.ne.s32.totalorder %s22_s9, %s884_s10  ;;  %p889_p6 = scmp.lt.s32.totalorder %s22_s9, %s22_s9 }
  0x14   :  { %p890_p7 = scmp.lt.s32.totalorder %s888_s11, %s884_s10 }
  0x16   :  { %p891_p8 = por %p890_p7, %p889_p6 }
  0x18   :  { %p892_p9 = pnand %p891_p8, %p885_p5 }
  0x1a   :  { %895 = shalt.err (!%p892_p9)
}
  0x1b   :  { %s968_s12 = smov 32   ;;  %s969_s13 = smov 2  }
  0x1c   :  { %27 = dma.hbm_to_vmem [thread:$0]  %s1056_s0, 32, %s22_s9, [#allocation3], %s968_s12, %s968_s12, %s969_s13  }
  0x1d   :  { %s970_s16 = smov [#allocation7]   ;;  %s971_s1 = smov [#allocation8]  }
  0x1e   :  { %s47_s17 = sshll.u32 %s970_s16, 4  ;;  %s61_s18 = sshll.u32 %s971_s1, 4  ;;  %s48_s17 = int_to_ptr.vmem [resolvable:$true] %s47_s17  ;;  %s62_s18 = int_to_ptr.vmem [resolvable:$true] %s61_s18 }
  0x1f   :  { %s904_s19 = scalar_lea.vmem %s48_s17, 4096  ;;  %p909_p11 = scmp.lt.s32.totalorder %s48_s17, %s48_s17 }
  0x20   :  { %p905_p10 = scmp.ne.s32.totalorder %s48_s17, %s904_s19  ;;  %p910_p12 = scmp.lt.s32.totalorder %s904_s19, %s904_s19 }
  0x22   :  { %p911_p13 = por %p910_p12, %p909_p11 }
  0x24   :  { %p912_p0 = pnand %p911_p13, %p905_p10 }
  0x26   :  { %915 = shalt.err (!%p912_p0)
}
  0x27   :  { %53 = dma.hbm_to_vmem [thread:$0]  %s1059_s3, 4096, %s48_s17, [#allocation6], %s965_s27, %s965_s27, %s966_s28  }
  0x28   :  { %s924_s0 = scalar_lea.vmem %s62_s18, 2048  ;;  %p929_p2 = scmp.lt.s32.totalorder %s62_s18, %s62_s18 }
  0x29   :  { %p925_p1 = scmp.ne.s32.totalorder %s62_s18, %s924_s0  ;;  %p930_p3 = scmp.lt.s32.totalorder %s924_s0, %s924_s0 }
  0x2b   :  { %p931_p4 = por %p930_p3, %p929_p2 }
  0x2d   :  { %p932_p5 = pnand %p931_p4, %p925_p1 }
  0x2f   :  { %935 = shalt.err (!%p932_p5)
}
  0x30   :  { %s972_s22 = smov 64   ;;  %s973_s23 = smov 4  }
  0x31   :  { %67 = dma.hbm_to_vmem [thread:$0]  %s1061_s5, 2048, %s62_s18, [#allocation9], %s972_s22, %s972_s22, %s973_s23  }
  0x32   :  { %956 = dma.done.wait [#allocation3], 256  }
  0x33   :  { %957 = vsyncadd [#allocation3], 4294967040 }
  0x34   :  { %958 = dma.done.wait [#allocation6], 4352  }
  0x35   :  { %959 = vsyncadd [#allocation6], 4294962944 }
  0x36   :  { %960 = dma.done.wait [#allocation9], 2048  }
  0x37   :  { %961 = vsyncadd [#allocation9], 4294965248  ;;  %v974_v0 = vmov 0   ;;  %v785_v1 = vld [vmem:[#allocation5 + $0x4] ss:$8 sps:$4 sm:$0xff]   ;;  %v83_v3 = vld [vmem:[#allocation2] sm:$0xff]  ;;  %v90_v48 = vlaneseq }
  0x38   :  { %146 = vmatprep.mubr.bf16.mxu0 %v974_v0  ;;  %v787_v2 = vld [vmem:[#allocation5] ss:$8 sps:$4 sm:$0xff]   ;;  %v84_v4 = vld [vmem:[#allocation2 + $0x8] sm:$0xff]  ;;  %128 = vmatprep.subr.bf16.mxu0 %v785_v1  ;;  %v788_v6 = vld [vmem:[#allocation7 + $0x74] ss:$8 sps:$4 sm:$0xff]   ;;  %vm110_vm0 = vcmask 130048  }
  0x39   :  { %v85_v5 = vpack.c.bf16 %v84_v4, %v83_v3  ;;  %129 = vmatpush1.bf16.msra.mxu0 %v787_v2  ;;  %v790_v7 = vld [vmem:[#allocation7 + $0x70] ss:$8 sps:$4 sm:$0xff]   ;;  %367 = vmatprep.subr.bf16.mxu1 %v788_v6  ;;  %v791_v8 = vld [vmem:[#allocation7 + $0x64] ss:$8 sps:$4 sm:$0xff]   ;;  %v793_v9 = vld [vmem:[#allocation7 + $0x60] ss:$8 sps:$4 sm:$0xff]  }
  0x3a   :  { %368 = vmatpush1.bf16.msra.mxu1 %v790_v7  ;;  %v794_v10 = vld [vmem:[#allocation7 + $0x54] ss:$8 sps:$4 sm:$0xff]   ;;  %v796_v11 = vld [vmem:[#allocation7 + $0x50] ss:$8 sps:$4 sm:$0xff]   ;;  %v797_v12 = vld [vmem:[#allocation7 + $0x44] ss:$8 sps:$4 sm:$0xff]  }
  0x3b   :  { %369 = vmatprep.subr.bf16.mxu1 %v791_v8  ;;  %v799_v13 = vld [vmem:[#allocation7 + $0x40] ss:$8 sps:$4 sm:$0xff]   ;;  %v800_v14 = vld [vmem:[#allocation7 + $0x34] ss:$8 sps:$4 sm:$0xff]   ;;  %v802_v15 = vld [vmem:[#allocation7 + $0x30] ss:$8 sps:$4 sm:$0xff]  }
  0x3c   :  { %693 = vmatmul.mubr.msk.bf16.vlgmr.msra.gmra.mxu0 %vm110_vm0, %v85_v5  ;;  %v803_v16 = vld [vmem:[#allocation7 + $0x24] ss:$8 sps:$4 sm:$0xff]   ;;  %v805_v17 = vld [vmem:[#allocation7 + $0x20] ss:$8 sps:$4 sm:$0xff]   ;;  %v806_v18 = vld [vmem:[#allocation7 + $0x14] ss:$8 sps:$4 sm:$0xff]  }
  0x3d   :  { %v808_v19 = vld [vmem:[#allocation7 + $0x10] ss:$8 sps:$4 sm:$0xff]   ;;  %v809_v20 = vld [vmem:[#allocation7 + $0x4] ss:$8 sps:$4 sm:$0xff]   ;;  %v811_v21 = vld [vmem:[#allocation7] ss:$8 sps:$4 sm:$0xff]  }
  0x3e   :  { %370 = vmatpush1.bf16.msra.mxu1 %v793_v9  ;;  %v812_v22 = vld [vmem:[#allocation7 + $0xf4] ss:$8 sps:$4 sm:$0xff]   ;;  %v814_v23 = vld [vmem:[#allocation7 + $0xf0] ss:$8 sps:$4 sm:$0xff]   ;;  %v815_v24 = vld [vmem:[#allocation7 + $0xe4] ss:$8 sps:$4 sm:$0xff]  }
  0x3f   :  { %371 = vmatprep.subr.bf16.mxu1 %v794_v10  ;;  %v817_v25 = vld [vmem:[#allocation7 + $0xe0] ss:$8 sps:$4 sm:$0xff]   ;;  %v818_v26 = vld [vmem:[#allocation7 + $0xd4] ss:$8 sps:$4 sm:$0xff]   ;;  %v820_v27 = vld [vmem:[#allocation7 + $0xd0] ss:$8 sps:$4 sm:$0xff]  }
  0x40   :  { %v821_v28 = vld [vmem:[#allocation7 + $0xc4] ss:$8 sps:$4 sm:$0xff]   ;;  %v823_v29 = vld [vmem:[#allocation7 + $0xc0] ss:$8 sps:$4 sm:$0xff]   ;;  %v824_v30 = vld [vmem:[#allocation7 + $0xb4] ss:$8 sps:$4 sm:$0xff]  }
  0x41   :  { %v826_v31 = vld [vmem:[#allocation7 + $0xb0] ss:$8 sps:$4 sm:$0xff]   ;;  %v827_v32 = vld [vmem:[#allocation7 + $0xa4] ss:$8 sps:$4 sm:$0xff]   ;;  %v829_v33 = vld [vmem:[#allocation7 + $0xa0] ss:$8 sps:$4 sm:$0xff]  }
  0x42   :  { %372 = vmatpush1.bf16.msra.mxu1 %v796_v11  ;;  %v830_v34 = vld [vmem:[#allocation7 + $0x94] ss:$8 sps:$4 sm:$0xff]   ;;  %v832_v35 = vld [vmem:[#allocation7 + $0x90] ss:$8 sps:$4 sm:$0xff]   ;;  %v833_v36 = vld [vmem:[#allocation7 + $0x84] ss:$8 sps:$4 sm:$0xff]  }
  0x43   :  { %373 = vmatprep.subr.bf16.mxu1 %v797_v12  ;;  %v835_v37 = vld [vmem:[#allocation7 + $0x80] ss:$8 sps:$4 sm:$0xff]   ;;  %v836_v38 = vld [vmem:[#allocation8 + $0x78] sm:$0xff]   ;;  %v838_v40 = vld [vmem:[#allocation8 + $0x70] sm:$0xff]   ;;  %v1038_v49 = vshrl.u32 %v90_v48, 7 }
  0x44   :  { %v837_v39 = vld [vmem:[#allocation8 + $0x38] sm:$0xff]   ;;  %748 = vmatprep.subr.bf16.mxu0 %v836_v38  ;;  %v839_v41 = vld [vmem:[#allocation8 + $0x30] sm:$0xff]   ;;  %v840_v42 = vld [vmem:[#allocation8 + $0x68] sm:$0xff]  }
  0x45   :  { %749 = vmatpush3.bf16.msra.mxu0 %v837_v39  ;;  %v841_v43 = vld [vmem:[#allocation8 + $0x28] sm:$0xff]   ;;  %v842_v44 = vld [vmem:[#allocation8 + $0x60] sm:$0xff]   ;;  %v844_v46 = vld [vmem:[#allocation8 + $0x58] sm:$0xff]   ;;  %v96_v50 = vsub.s32 1, %v1038_v49  ;;  %v92_v51 = vsub.s32 0, %v1038_v49 }
  0x46   :  { %374 = vmatpush1.bf16.msra.mxu1 %v799_v13  ;;  %750 = vmatprep.subr.bf16.mxu0 %v838_v40  ;;  %v843_v45 = vld [vmem:[#allocation8 + $0x20] sm:$0xff]   ;;  %v845_v47 = vld [vmem:[#allocation8 + $0x18] sm:$0xff]   ;;  %v846_v5 = vld [vmem:[#allocation8 + $0x50] sm:$0xff]  }
  0x47   :  { %375 = vmatprep.subr.bf16.mxu1 %v800_v14  ;;  %v88_v52 = vld [vmem:[%s1058_s2] sm:$0x3]  ;;  %v847_v6 = vld [vmem:[#allocation8 + $0x10] sm:$0xff]   ;;  %v848_v7 = vld [vmem:[#allocation8 + $0x48] sm:$0xff]  }
  0x48   :  { %v97_v54 = vrot.slane %v88_v52, %v96_v50  ;;  %v93_v55 = vrot.slane %v88_v52, %v92_v51  ;;  %v849_v8 = vld [vmem:[#allocation8 + $0x8] sm:$0xff]   ;;  %v850_v9 = vld [vmem:[#allocation8 + $0x40] sm:$0xff]  }
  0x49   :  { %751 = vmatpush3.bf16.msra.mxu0 %v839_v41  ;;  %v851_v10 = vld [vmem:[#allocation8] sm:$0xff]  }
  0x4a   :  { %376 = vmatpush1.bf16.msra.mxu1 %v802_v15  ;;  %752 = vmatprep.subr.bf16.mxu0 %v840_v42  ;;  %v195_v11 = vld [vmem:[%s1060_s4] sm:$0x3] }
  0x4b   :  { %377 = vmatprep.subr.bf16.mxu1 %v803_v16  ;;  %v204_v13 = vrot.slane %v195_v11, %v96_v50  ;;  %v200_v14 = vrot.slane %v195_v11, %v92_v51 }
  0x4d   :  { %753 = vmatpush3.bf16.msra.mxu0 %v841_v43  ;;  %v975_v43 = vmov 1966171168  }
  0x4e   :  { %378 = vmatpush1.bf16.msra.mxu1 %v805_v17  ;;  %754 = vmatprep.subr.bf16.mxu0 %v842_v44  ;;  %v609_v44 = vunpack.c.l.s4 %v975_v43 }
  0x4f   :  { %379 = vmatprep.subr.bf16.mxu1 %v806_v18 }
  0x51   :  { %755 = vmatpush3.bf16.msra.mxu0 %v843_v45  ;;  %v593_v45 = vand.u32 127, %v90_v48 }
  0x52   :  { %380 = vmatpush1.bf16.msra.mxu1 %v808_v19  ;;  %756 = vmatprep.subr.bf16.mxu0 %v844_v46  ;;  %v610_v46 = vunpack.c.0.s8 %v609_v44 }
  0x53   :  { %381 = vmatprep.subr.bf16.mxu1 %v809_v20  ;;  %vm602_vm1 = vcmp.ge.s32.totalorder %v593_v45, 4 }
  0x54   :  { %v613_v51 = vsub.s32 %v610_v46, %v1038_v49 }
  0x55   :  { %757 = vmatpush3.bf16.msra.mxu0 %v845_v47 }
  0x56   :  { %382 = vmatpush1.bf16.msra.mxu1 %v811_v21  ;;  %758 = vmatprep.subr.bf16.mxu0 %v846_v5 }
  0x57   :  { %383 = vmatprep.subr.bf16.mxu1 %v812_v22 }
  0x59   :  { %759 = vmatpush3.bf16.msra.mxu0 %v847_v6 }
  0x5a   :  { %384 = vmatpush2.bf16.msra.mxu1 %v814_v23  ;;  %760 = vmatprep.subr.bf16.mxu0 %v848_v7 }
  0x5b   :  { %385 = vmatprep.subr.bf16.mxu1 %v815_v24 }
  0x5d   :  { %761 = vmatpush3.bf16.msra.mxu0 %v849_v8 }
  0x5e   :  { %386 = vmatpush2.bf16.msra.mxu1 %v817_v25  ;;  %762 = vmatprep.subr.bf16.mxu0 %v850_v9 }
  0x5f   :  { %387 = vmatprep.subr.bf16.mxu1 %v818_v26 }
  0x61   :  { %763 = vmatpush3.bf16.msra.mxu0 %v851_v10 }
  0x62   :  { %388 = vmatpush2.bf16.msra.mxu1 %v820_v27 }
  0x63   :  { %389 = vmatprep.subr.bf16.mxu1 %v821_v28 }
  0x66   :  { %390 = vmatpush2.bf16.msra.mxu1 %v823_v29  ;;  %v726_v29 = vld [vmem:[%s1062_s6] ss:$0 sm:$0xff] }
  0x67   :  { %391 = vmatprep.subr.bf16.mxu1 %v824_v30 }
  0x6a   :  { %392 = vmatpush2.bf16.msra.mxu1 %v826_v31 }
  0x6b   :  { %393 = vmatprep.subr.bf16.mxu1 %v827_v32 }
  0x6e   :  { %394 = vmatpush2.bf16.msra.mxu1 %v829_v33 }
  0x6f   :  { %395 = vmatprep.subr.bf16.mxu1 %v830_v34 }
  0x72   :  { %396 = vmatpush2.bf16.msra.mxu1 %v832_v35 }
  0x73   :  { %397 = vmatprep.subr.bf16.mxu1 %v833_v36 }
  0x76   :  { %398 = vmatpush2.bf16.msra.mxu1 %v835_v37 }
  0xfc   :  { %v148_v53 = vpop.f32.mrf.mxu0 }
  0xfd   :  { %v149_v60 = vadd.f32 %v148_v53, %v93_v55 }
  0xfe   :  { %v150_v56 = vpop.f32.mrf.mxu0 }
  0xff   :  { %v151_v58 = vadd.f32 %v150_v56, %v97_v54  ;;  %v157_v2 = vmax.f32 %v149_v60, 0.0 }
 0x100   :  { %v152_v57 = vpop.f32.mrf.mxu0 }
 0x101   :  { %v153_v59 = vadd.f32 %v152_v57, %v93_v55  ;;  %v158_v0 = vmax.f32 %v151_v58, 0.0 }
 0x102   :  { %v154_v61 = vpop.f32.mrf.mxu0 }
 0x103   :  { %v155_v62 = vadd.f32 %v154_v61, %v97_v54  ;;  %v159_v63 = vmax.f32 %v153_v59, 0.0 }
 0x105   :  { %v160_v1 = vmax.f32 %v155_v62, 0.0  ;;  %v161_v4 = vpack.c.bf16 %v159_v63, %v157_v2 }
 0x107   :  { %v162_v3 = vpack.c.bf16 %v160_v1, %v158_v0 }
 0x109   :  { %399 = vmatprep.mubr.bf16.mxu1 %v162_v3 }
 0x10a   :  { %400 = vmatmul.mubr.bf16.vlgmr.msra.gmra.mxu1 %v161_v4 }
 0x1ca   :  { %v401_v12 = vpop.f32.mrf.mxu1 }
 0x1cb   :  { %v402_v19 = vadd.f32 %v401_v12, %v200_v14 }
 0x1cc   :  { %v403_v15 = vpop.f32.mrf.mxu1 }
 0x1cd   :  { %v404_v17 = vadd.f32 %v403_v15, %v204_v13  ;;  %v410_v25 = vmax.f32 %v402_v19, 0.0 }
 0x1ce   :  { %v405_v16 = vpop.f32.mrf.mxu1 }
 0x1cf   :  { %v406_v18 = vadd.f32 %v405_v16, %v200_v14  ;;  %v411_v23 = vmax.f32 %v404_v17, 0.0 }
 0x1d0   :  { %v407_v20 = vpop.f32.mrf.mxu1 }
 0x1d1   :  { %v408_v21 = vadd.f32 %v407_v20, %v204_v13  ;;  %v412_v22 = vmax.f32 %v406_v18, 0.0 }
 0x1d3   :  { %v413_v24 = vmax.f32 %v408_v21, 0.0  ;;  %v414_v27 = vpack.c.bf16 %v412_v22, %v410_v25 }
 0x1d5   :  { %v415_v26 = vpack.c.bf16 %v413_v24, %v411_v23 }
 0x1d7   :  { %583 = vmatprep.mubr.bf16.mxu0 %v415_v26 }
 0x1d8   :  { %584 = vmatmul.mubr.bf16.vlgmr.msra.gmra.mxu0 %v414_v27 }
 0x298   :  { %v764_v28 = vpop.f32.mrf.mxu0 }
 0x29a   :  { %v765_v30 = vpop.f32.mrf.mxu0 }
 0x29b   :  { %v766_v31 = vadd.f32 %v765_v30, %v764_v28 }
 0x29c   :  { %v767_v32 = vpop.f32.mrf.mxu0 }
 0x29d   :  { %v586_v33 = vadd.f32 %v766_v31, %v726_v29 }
 0x29e   :  { %v768_v34 = vpop.f32.mrf.mxu0 }
 0x29f   :  { %v594_v35 = vmax.f32 %v586_v33, -20.0  ;;  %v769_v36 = vadd.f32 %v768_v34, %v767_v32 }
 0x2a1   :  { %v596_v37 = vmin.f32 %v594_v35, 2.0  ;;  %v589_v38 = vadd.f32 %v769_v36, %v726_v29 }
 0x2a3   :  { %v598_v39 = vmul.f32 1.442695, %v596_v37  ;;  %v595_v40 = vmax.f32 %v589_v38, -20.0 }
 0x2a5   :  { %v597_v41 = vmin.f32 %v595_v40, 2.0  ;;  %852 = vpow2.f32 %v598_v39 }
 0x2a7   :  { %v600_v42 = vmul.f32 1.442695, %v597_v41 }
 0x2a9   :  { %854 = vpow2.f32 %v600_v42 }
 0x2b2   :  { %v853_v47 = vpop.eup %852 }
 0x2b3   :  { %v603_v52 = vsel %vm602_vm1, %v853_v47, %v586_v33 }
 0x2b6   :  { %v855_v50 = vpop.eup %854 }
 0x2b7   :  { %v604_v53 = vsel %vm602_vm1, %v855_v50, %v589_v38 }
 0x2b8   :  { %v605_v54 = vpack.c.bf16 %v604_v53, %v603_v52  ;;  %v743_v55 = vpack.c.bf16 %v604_v53, %v604_v53 }
 0x2ba   :  { %v614_v56 = vrot.slane %v605_v54, %v613_v51  ;;  %v621_v57 = vrot.slane %v743_v55, %v613_v51 }
 0x2bc   :  { %v622_v58 = vcombine.high %v614_v56, %v614_v56  ;;  %v623_v59 = vcombine.high %v621_v57, %v621_v57  ;;  %v630_v60 = vrot.slane %v614_v56, %v613_v51  ;;  %v637_v61 = vrot.slane %v621_v57, %v613_v51  ;;  %744 = vst.sshfl [vmem:[#allocation10] sm:$0x1 pattern:$0x73625140] %v614_v56 }
 0x2bd   :  { %746 = vst.sshfl [vmem:[#allocation10 + $0x4] sm:$0x1 pattern:$0x73625140] %v621_v57 }
 0x2be   :  { %v644_v62 = vrot.slane %v622_v58, %v613_v51  ;;  %v651_v48 = vrot.slane %v623_v59, %v613_v51  ;;  %v652_v63 = vcombine.high %v630_v60, %v630_v60  ;;  %v653_v0 = vcombine.high %v637_v61, %v637_v61  ;;  %745 = vst.sshfl [vmem:[#allocation10 + $0x1] sm:$0x1 pattern:$0x73625140] %v622_v58 }
 0x2bf   :  { %747 = vst.sshfl [vmem:[#allocation10 + $0x5] sm:$0x1 pattern:$0x73625140] %v623_v59 }
 0x2c0   :  { %v654_v1 = vcombine.high %v644_v62, %v644_v62  ;;  %v655_v49 = vcombine.high %v651_v48, %v651_v48  ;;  %666 = vst [vmem:[#allocation10 + $0x2] sm:$0x1] %v652_v63  ;;  %670 = vst [vmem:[#allocation10 + $0x6] sm:$0x1] %v653_v0 }
 0x2c2   :  { %667 = vst [vmem:[#allocation10 + $0x3] sm:$0x1] %v654_v1  ;;  %671 = vst [vmem:[#allocation10 + $0x7] sm:$0x1] %v655_v49 }
 0x2c3   :  { %676 = vsyncadd [#allocation4], 112  ;;  %s976_s6 = smov [#allocation10]  }
 0x2c4   :  { %s677_s28 = sshll.u32 %s976_s6, 4  ;;  %s678_s28 = int_to_ptr.vmem [resolvable:$true] %s677_s28 }
 0x2c5   :  { %s936_s29 = scalar_lea.vmem %s678_s28, 16  ;;  %s940_s30 = scalar_lea.vmem %s678_s28, 128 }
 0x2c6   :  { %p937_p6 = scmp.ne.s32.totalorder %s678_s28, %s936_s29  ;;  %p941_p7 = scmp.lt.s32.totalorder %s678_s28, %s678_s28 }
 0x2c7   :  { %p942_p8 = scmp.lt.s32.totalorder %s940_s30, %s936_s29 }
 0x2c9   :  { %p943_p9 = por %p942_p8, %p941_p7 }
 0x2cb   :  { %p944_p10 = pnand %p943_p9, %p937_p6 }
 0x2cd   :  { %947 = shalt.err (!%p944_p10)
}
 0x2ce   :  { %s977_s8 = smov 16   ;;  %s978_s9 = smov 1  }
 0x2cf   :  { %683 = dma.vmem_to_hbm [thread:$0]  %s678_s28, 16, %s1063_s7, [#allocation4], %s977_s8, %s977_s8, %s978_s9  }
 0x2d0   :  { %962 = dma.done.wait [#allocation4], 128  }
 0x2d1   :  { %963 = vsyncadd [#allocation4], 4294967168 }
 0x2d2   :  { %687 = vsyncpa [#allocation3], 1 }
 0x2d3   :  { %688 = vsyncpa [#allocation6], 1 }
 0x2d4   :  { %689 = vsyncpa [#allocation9], 1 }
 0x2d5   :  { %690 = vsyncpa [#allocation4], 1 }

</bundles_post_ra>
